<compile_context>
chip_gen: v7x
topology: tpu7x:2x2x1
jax: 0.10.0
libtpu: 0.0.40
codegen_flags: <defaults>
</compile_context>

<pallas_src>
import functools

import jax
import jax.numpy as jnp
from jax import lax
from jax.experimental import pallas as pl
from jax.experimental.pallas import tpu as pltpu

EPS = 1e-5


def _round_up(a, b):
    return (a + b - 1) // b * b


def _default_vmem_limit():
    # v5e/v6e: 128 MiB physical VMEM -> raise the scoped limit; v7x: 64 MiB/TC -> stay
    # under ~48 MiB and get block-size headroom from bf16 gi/weights instead.
    try:
        cap = pltpu.get_tpu_info().vmem_capacity_bytes
        if cap >= 96 * 1024 * 1024:
            return 100 * 1024 * 1024
    except Exception:
        pass
    return 48 * 1024 * 1024


def _pad_gate_cols(w, H, Hp):
    """(K, 3H) -> (K, 3Hp): zero-pad each of the [r, z, n] gate blocks separately."""
    if Hp == H:
        return w
    K = w.shape[0]
    w3 = w.reshape(K, 3, H)
    return jnp.zeros((K, 3, Hp), w.dtype).at[:, :, :H].set(w3).reshape(K, 3 * Hp)


# ---------------- pass 1: BatchNorm batch statistics (tiled row reduction) ----------------
def bn_stats_kernel(x_ref, sum_ref, sq_ref):
    @pl.when(pl.program_id(0) == 0)
    def _():
        sum_ref[...] = jnp.zeros_like(sum_ref)
        sq_ref[...] = jnp.zeros_like(sq_ref)

    x = x_ref[...].astype(jnp.float32)
    sum_ref[...] += jnp.sum(x, axis=0, keepdims=True)
    sq_ref[...] += jnp.sum(x * x, axis=0, keepdims=True)


def bn_stats(x_flat, row_block, vmem_limit):
    R, D = x_flat.shape
    s, q = pl.pallas_call(
        bn_stats_kernel,
        out_shape=(jax.ShapeDtypeStruct((1, D), jnp.float32),
                   jax.ShapeDtypeStruct((1, D), jnp.float32)),
        grid=(R // row_block,),
        in_specs=[pl.BlockSpec((row_block, D), lambda i: (i, 0))],
        out_specs=(pl.BlockSpec((1, D), lambda i: (0, 0)),
                   pl.BlockSpec((1, D), lambda i: (0, 0))),
        compiler_params=pltpu.CompilerParams(
            dimension_semantics=("arbitrary",),  # reduction axis: outputs stay resident
            vmem_limit_bytes=vmem_limit),
    )(x_flat)
    return s[0], q[0]


# ------------- pass 2: gi = x @ W_eff + b_eff for every timestep (parallel matmul) -------------
def gi_kernel(x_ref, w_ref, b_ref, gi_ref):
    gi = jnp.dot(x_ref[...], w_ref[...], preferred_element_type=jnp.float32)
    gi_ref[...] = (gi + b_ref[...]).astype(gi_ref.dtype)


def gi_precompute(x_flat, w_eff, b_eff, row_block, gi_dtype, vmem_limit):
    R, D = x_flat.shape
    G = w_eff.shape[1]
    return pl.pallas_call(
        gi_kernel,
        out_shape=jax.ShapeDtypeStruct((R, G), gi_dtype),
        grid=(R // row_block,),
        in_specs=[pl.BlockSpec((row_block, D), lambda i: (i, 0)),
                  pl.BlockSpec((D, G), lambda i: (0, 0)),
                  pl.BlockSpec((1, G), lambda i: (0, 0))],
        out_specs=pl.BlockSpec((row_block, G), lambda i: (i, 0)),
        compiler_params=pltpu.CompilerParams(
            dimension_semantics=("parallel",),   # shards across TCs on v7x megacore
            vmem_limit_bytes=vmem_limit),
    )(x_flat, w_eff, b_eff)


# ---------------- pass 3: GRU recurrence, (batch block, time block) grid ----------------
def gru_rec_kernel(gi_ref, whh_ref, o_ref, h_ref, *, unroll):
    Tb, _, G = gi_ref.shape
    Hp = G // 3

    @pl.when(pl.program_id(1) == 0)       # start of each batch block: h0 = 0 (PyTorch default)
    def _():
        h_ref[...] = jnp.zeros_like(h_ref)

    whh = whh_ref[...]                    # weight-stationary across the time block

    def step(t, h):
        gi = gi_ref[t].astype(jnp.float32)                                   # (Nb, 3Hp)
        gh = jnp.dot(h.astype(whh.dtype), whh,
                     preferred_element_type=jnp.float32)                     # (Nb, 3Hp)
        # PyTorch gate ordering: [r, z, n]; slices are lane-aligned (Hp % 128 == 0).
        r = jax.nn.sigmoid(gi[:, 0:Hp] + gh[:, 0:Hp])
        z = jax.nn.sigmoid(gi[:, Hp:2 * Hp] + gh[:, Hp:2 * Hp])
        n = jnp.tanh(gi[:, 2 * Hp:3 * Hp] + r * gh[:, 2 * Hp:3 * Hp])
        h = (1.0 - z) * n + z * h
        o_ref[t] = h.astype(o_ref.dtype)
        return h

    # partial unroll: keeps LLO visibility without exploding live ranges / spills at large Hp
    h_ref[...] = lax.fori_loop(0, Tb, step, h_ref[...], unroll=unroll)


def gru_recurrent(gi, w_hh_pad, out_dtype, time_block, batch_block, unroll, vmem_limit):
    T_pad, Np, G = gi.shape
    Hp = G // 3
    return pl.pallas_call(
        functools.partial(gru_rec_kernel, unroll=unroll),
        out_shape=jax.ShapeDtypeStruct((T_pad, Np, Hp), out_dtype),
        grid=(Np // batch_block, T_pad // time_block),
        in_specs=[pl.BlockSpec((time_block, batch_block, G), lambda b, t: (t, b, 0)),
                  pl.BlockSpec((Hp, G), lambda b, t: (0, 0))],
        out_specs=pl.BlockSpec((time_block, batch_block, Hp), lambda b, t: (t, b, 0)),
        scratch_shapes=[pltpu.VMEM((batch_block, Hp), jnp.float32)],  # h carried across time
        compiler_params=pltpu.CompilerParams(
            dimension_semantics=("parallel", "arbitrary"),  # batch blocks parallel (v7x 2 TC)
            vmem_limit_bytes=vmem_limit),
    )(gi, w_hh_pad)


# ---------------- BatchRNN forward ----------------
def batch_rnn_forward(x, params, *, time_block=32, batch_blocks=1,
                      matmul_dtype=jnp.float32, gi_dtype=jnp.bfloat16,
                      out_dtype=jnp.float32, unroll=4, vmem_limit_bytes=None):
    # matmul_dtype=jnp.bfloat16 engages the wide bf16 MXU path and halves weight/x DMA;
    # gi_dtype=jnp.bfloat16 halves the dominant gi HBM stream; gate math stays f32.
    # TODO(synk): bidirectional=True branch (reverse pass + sum over directions) not
    # implemented; module default is bidirectional=False.
    # TODO(synk): BatchNorm running_mean/running_var (momentum) update / eval-mode stats not
    # modeled; this matches the training-mode forward only.
    # TODO(synk): variance uses E[x^2]-E[x]^2 (single pass); use a two-pass/shifted scheme if
    # inputs are far from zero-centered.
    T, N, D = x.shape
    H = params["w_hh_t"].shape[0]
    vmem_limit = _default_vmem_limit() if vmem_limit_bytes is None else vmem_limit_bytes

    gamma = params["gamma"].astype(jnp.float32)
    beta = params["beta"].astype(jnp.float32)
    w_ih_t = params["w_ih_t"].astype(jnp.float32)     # (D, 3H)  (PyTorch weight_ih_l0.T)
    w_hh_t = params["w_hh_t"].astype(jnp.float32)     # (H, 3H)  (PyTorch weight_hh_l0.T)

    # lane/sublane-aligned padded sizes
    sub = 16 if matmul_dtype == jnp.bfloat16 else 8   # bf16 packs 16 rows / sublane group
    Np = _round_up(N, sub)
    Hp = _round_up(H, 128)          # lane alignment -> aligned gate slices, dense stores
    Tb = min(time_block, T)
    T_pad = _round_up(T, Tb)
    if batch_blocks > 1 and Np % batch_blocks == 0 and (Np // batch_blocks) % 8 == 0:
        Nb = Np // batch_blocks
    else:
        Nb = Np

    # ---- single up-front pad of x into its final flat layout (one HBM materialization) ----
    rows_pad = T_pad * Np
    x_flat = jnp.pad(x.astype(matmul_dtype),
                     ((0, T_pad - T), (0, Np - N), (0, 0))).reshape(rows_pad, D)

    # row block for passes 1/2: a whole number of timesteps, capped to keep VMEM modest
    row_target = 1024
    rb_t = Tb
    while rb_t > 1 and rb_t * Np > row_target and rb_t % 2 == 0:
        rb_t //= 2
    Rb = rb_t * Np                                    # divides rows_pad by construction

    # ---- pass 1: batch statistics over the real (T*N, D) rows (zero pad rows are inert) ----
    s, q = bn_stats(x_flat, Rb, vmem_limit)
    cnt = jnp.float32(T * N)
    mean = s / cnt
    var = jnp.maximum(q / cnt - mean * mean, 0.0)     # biased var (PyTorch norm path)
    inv = lax.rsqrt(var + EPS)
    scale = gamma * inv                               # (D,)
    shift = beta - mean * scale                       # (D,)

    # ---- fold BN affine into the input projection (f32 fold); xn is never materialized ----
    w_eff = scale[:, None] * w_ih_t                   # (D, 3H)
    b_eff = shift @ w_ih_t                            # (3H,)
    w_eff = _pad_gate_cols(w_eff, H, Hp)              # (D, 3Hp)
    b_eff = _pad_gate_cols(b_eff[None, :], H, Hp)     # (1, 3Hp), f32 (added post-accumulate)

    # ---- pass 2: hoisted input projection; output already in final layout ----
    gi_flat = gi_precompute(x_flat, w_eff.astype(matmul_dtype), b_eff,
                            Rb, gi_dtype, vmem_limit)           # (rows_pad, 3Hp)
    gi = gi_flat.reshape(T_pad, Np, 3 * Hp)                     # metadata-only reshape

    # ---- pass 3: sequential recurrence over time blocks (batch blocks parallel) ----
    w_hh_p = _pad_gate_cols(w_hh_t, H, Hp)                               # (H, 3Hp)
    w_hh_p = jnp.zeros((Hp, 3 * Hp), jnp.float32).at[:H].set(w_hh_p)     # (Hp, 3Hp)
    out = gru_recurrent(gi, w_hh_p.astype(matmul_dtype), out_dtype,
                        Tb, Nb, unroll, vmem_limit)                      # (T_pad, Np, Hp)

    return out[:T, :N, :H]


# ---------------- pure-JAX reference for verification ----------------
def reference(x, params):
    T, N, D = x.shape
    H = params["w_hh_t"].shape[0]
    xf = x.reshape(T * N, D).astype(jnp.float32)
    mean = xf.mean(0)
    var = ((xf - mean) ** 2).mean(0)
    xn = ((xf - mean) / jnp.sqrt(var + EPS)) * params["gamma"] + params["beta"]
    xn = xn.reshape(T, N, D)

    def step(h, x_t):
        gi = x_t @ params["w_ih_t"]
        gh = h @ params["w_hh_t"]
        r = jax.nn.sigmoid(gi[:, :H] + gh[:, :H])
        z = jax.nn.sigmoid(gi[:, H:2 * H] + gh[:, H:2 * H])
        n = jnp.tanh(gi[:, 2 * H:] + r * gh[:, 2 * H:])
        h = (1.0 - z) * n + z * h
        return h, h

    _, ys = jax.lax.scan(step, jnp.zeros((N, H), jnp.float32), xn)
    return ys


if __name__ == "__main__":
    T, N, D, H = 16, 4, 16, 32
    key = jax.random.PRNGKey(0)
    k_x, k_ih, k_hh, k_g, k_b = jax.random.split(key, 5)

    x = jax.random.normal(k_x, (T, N, D), dtype=jnp.float32)

    bound = 1.0 / jnp.sqrt(H)  # PyTorch GRU init: U(-1/sqrt(H), 1/sqrt(H))
    # Weights stored pre-transposed: weight_ih_l0 is (3H, D) in PyTorch -> (D, 3H) here.
    w_ih_t = jax.random.uniform(k_ih, (D, 3 * H), jnp.float32, -bound, bound)
    w_hh_t = jax.random.uniform(k_hh, (H, 3 * H), jnp.float32, -bound, bound)
    gamma = 1.0 + 0.1 * jax.random.normal(k_g, (D,), jnp.float32)
    beta = 0.1 * jax.random.normal(k_b, (D,), jnp.float32)

    params = {"w_ih_t": w_ih_t, "w_hh_t": w_hh_t, "gamma": gamma, "beta": beta}

    ref = jax.block_until_ready(reference(x, params))

    # Exact-precision path (f32 everywhere): tight check against the reference.
    out = batch_rnn_forward(x, params, time_block=8, batch_blocks=1,
                            matmul_dtype=jnp.float32, gi_dtype=jnp.float32,
                            out_dtype=jnp.float32, unroll=4)
    out = jax.block_until_ready(out)
    assert out.shape == (T, N, H), out.shape
    err = float(jnp.max(jnp.abs(out - ref)))
    assert jnp.allclose(out, ref, rtol=1e-3, atol=1e-4), err

    # Fast path (bf16 MXU inputs, bf16 gi stream, bf16 output, batch-parallel recurrence
    # axis for v7x's two TensorCores): loose check.
    out_fast = batch_rnn_forward(x, params, time_block=8, batch_blocks=2,
                                 matmul_dtype=jnp.bfloat16, gi_dtype=jnp.bfloat16,
                                 out_dtype=jnp.bfloat16, unroll=4)
    out_fast = jax.block_until_ready(out_fast).astype(jnp.float32)
    assert out_fast.shape == (T, N, H), out_fast.shape
    err_fast = float(jnp.max(jnp.abs(out_fast - ref)))
    assert err_fast < 0.1, err_fast

    print("KERNEL_OK")
</pallas_src>

<mosaic_0001>
module attributes {stable_mosaic.version = 11 : i64} {
  func.func @bn_stats_kernel(%arg0: i32, %arg1: memref<64x16xf32, #tpu.memory_space<vmem>>, %arg2: memref<1x16xf32, #tpu.memory_space<vmem>>, %arg3: memref<1x16xf32, #tpu.memory_space<vmem>>) attributes {dimension_semantics = [#tpu.dimension_semantics<arbitrary>], iteration_bounds = array<i64: 2>, scalar_prefetch = 0 : i64, scratch_operands = 0 : i64, tpu.core_type = #tpu.core_type<tc>, window_params = [{transform_indices = @transform_0, window_bounds = array<i64: 64, 16>}, {pipeline_mode = #tpu.pipeline_mode<synchronous>, transform_indices = @transform_1, window_bounds = array<i64: 1, 16>}, {pipeline_mode = #tpu.pipeline_mode<synchronous>, transform_indices = @transform_2, window_bounds = array<i64: 1, 16>}]} {
    %c0_i32 = arith.constant 0 : i32
    %0 = arith.cmpi eq, %arg0, %c0_i32 : i32
    %1 = arith.extui %0 : i1 to i32
    %c0_i32_0 = arith.constant 0 : i32
    %2 = arith.cmpi ne, %1, %c0_i32_0 : i32
    scf.if %2 {
      %cst_11 = arith.constant 0.000000e+00 : f32
      %15 = vector.broadcast %cst_11 : f32 to vector<1x16xf32>
      %c0_12 = arith.constant 0 : index
      %c0_13 = arith.constant 0 : index
      %16 = vector.load %arg2[%c0_12, %c0_13] : memref<1x16xf32, #tpu.memory_space<vmem>>, vector<1x16xf32>
      tpu.vector_store %arg2[%c0_12, %c0_13], %15 {strides = array<i32>} : memref<1x16xf32, #tpu.memory_space<vmem>>, vector<1x16xf32>,
      %cst_14 = arith.constant 0.000000e+00 : f32
      %17 = vector.broadcast %cst_14 : f32 to vector<1x16xf32>
      %c0_15 = arith.constant 0 : index
      %c0_16 = arith.constant 0 : index
      %18 = vector.load %arg3[%c0_15, %c0_16] : memref<1x16xf32, #tpu.memory_space<vmem>>, vector<1x16xf32>
      tpu.vector_store %arg3[%c0_15, %c0_16], %17 {strides = array<i32>} : memref<1x16xf32, #tpu.memory_space<vmem>>, vector<1x16xf32>,
    } else {
    }
    %c0 = arith.constant 0 : index
    %c0_1 = arith.constant 0 : index
    %3 = vector.load %arg1[%c0, %c0_1] : memref<64x16xf32, #tpu.memory_space<vmem>>, vector<64x16xf32>
    %c0_2 = arith.constant 0 : index
    %c0_3 = arith.constant 0 : index
    %4 = vector.load %arg2[%c0_2, %c0_3] : memref<1x16xf32, #tpu.memory_space<vmem>>, vector<1x16xf32>
    %cst = arith.constant dense<0.000000e+00> : vector<16xf32>
    %5 = vector.multi_reduction <add>, %3, %cst [0] : vector<64x16xf32> to vector<16xf32>
    %6 = vector.shape_cast %5 : vector<16xf32> to vector<1x16xf32>
    %7 = arith.addf %4, %6 : vector<1x16xf32>
    %c0_4 = arith.constant 0 : index
    %c0_5 = arith.constant 0 : index
    %8 = vector.load %arg2[%c0_4, %c0_5] : memref<1x16xf32, #tpu.memory_space<vmem>>, vector<1x16xf32>
    tpu.vector_store %arg2[%c0_4, %c0_5], %7 {strides = array<i32>} : memref<1x16xf32, #tpu.memory_space<vmem>>, vector<1x16xf32>,
    %c0_6 = arith.constant 0 : index
    %c0_7 = arith.constant 0 : index
    %9 = vector.load %arg3[%c0_6, %c0_7] : memref<1x16xf32, #tpu.memory_space<vmem>>, vector<1x16xf32>
    %10 = arith.mulf %3, %3 : vector<64x16xf32>
    %cst_8 = arith.constant dense<0.000000e+00> : vector<16xf32>
    %11 = vector.multi_reduction <add>, %10, %cst_8 [0] : vector<64x16xf32> to vector<16xf32>
    %12 = vector.shape_cast %11 : vector<16xf32> to vector<1x16xf32>
    %13 = arith.addf %9, %12 : vector<1x16xf32>
    %c0_9 = arith.constant 0 : index
    %c0_10 = arith.constant 0 : index
    %14 = vector.load %arg3[%c0_9, %c0_10] : memref<1x16xf32, #tpu.memory_space<vmem>>, vector<1x16xf32>
    tpu.vector_store %arg3[%c0_9, %c0_10], %13 {strides = array<i32>} : memref<1x16xf32, #tpu.memory_space<vmem>>, vector<1x16xf32>,
    return
  }
  func.func @transform_0(%arg0: i32) -> (i32, i32) {
    %c0_i32 = arith.constant 0 : i32
    %c0_i32_0 = arith.constant 0 : i32
    return %arg0, %c0_i32 : i32, i32
  }
  func.func @transform_1(%arg0: i32) -> (i32, i32) {
    %c0_i32 = arith.constant 0 : i32
    %c0_i32_0 = arith.constant 0 : i32
    %c0_i32_1 = arith.constant 0 : i32
    return %c0_i32, %c0_i32_0 : i32, i32
  }
  func.func @transform_2(%arg0: i32) -> (i32, i32) {
    %c0_i32 = arith.constant 0 : i32
    %c0_i32_0 = arith.constant 0 : i32
    %c0_i32_1 = arith.constant 0 : i32
    return %c0_i32, %c0_i32_0 : i32, i32
  }
}

</mosaic_0001>

<bundles_post_ra>
// kernel: tpu_custom_call.1
= control target key start
LH: loop header
LB: loop body
LE: loop exit
PB: predicated region body
PF: predicated region fallthrough
CT: control target
= control target key end

     0   :  { %8 = vsyncpa [#allocation3], 0  ;;  %s485_s0 = inlined_call_operand.vmem [shape: f32[128,16], index: 0, kind: input, shape index: {}]   ;;  %s486_s1 = inlined_call_operand.hbm [shape: f32[1,16], index: 1, kind: output, shape index: {0}]   ;;  %s487_s2 = inlined_call_operand.hbm [shape: f32[1,16], index: 2, kind: output, shape index: {1}]  }
   0x1   :  { %9 = vsyncpa [#allocation5], 0  ;;  %s394_s9 = smov 0  }
   0x2 LB: > { %s400_s10 = sadd.s32 4294967295, %s374_s9   ;;  %p275_p0 = scmp.ge.s32.totalorder %s374_s9, 1  ;;  %s374_s9 = sphi %s394_s9, %s15_s9  }
   0x3   : > { %p108_p1 = scmp.lt.s32.totalorder %s374_s9, 3 }
   0x5   : > { %p109_p2 = pnand %p275_p0, %p108_p1 }
   0x6   : > { %s276_s11 = sshll.u32 (!%p109_p2), %s400_s10, 3  ;;  %p278_p4 = scmp.ne.s32.totalorder (!%p109_p2), %s400_s10, 0 }
   0x7   : > { %112 = sbr.rel (%p109_p2) target bundleno = 89 (0x59), region = 24  ;;  %p126_p3 = scmp.lt.s32.totalorder (!%p109_p2), %s276_s11, 15 }
   0xe   : > { %s489_s11 = smov (!%p126_p3, %s276_s11), 15  ;;  %134 = sbr.rel (%p278_p4) target bundleno = 21 (0x15), region = 28 }
   0xf   : > { %s277_s12 = sshll.u32 %s489_s11, 3  ;;  %vm135_vm0 = vcmask (!%p278_p4), 122880   ;;  %v376_v0 = vmov (!%p278_p4), 0.0  }
  0x10   : > { %s408_s15 = scalar_lea.vmem %s485_s0, %s277_s12  ;;  %136 = vst.msk [vmem:[#allocation2] sm:$0x1] (!%p278_p4), %vm135_vm0, %v376_v0  ;;  %137 = vst.msk [vmem:[#allocation4] sm:$0x1] (!%p278_p4), %vm135_vm0, %v376_v0 }
  0x15 PF: > { %v138_v1 = vld [vmem:[%s408_s15] sm:$0xff]  ;;  %v139_v2 = vld [vmem:[%s408_s15 + $0x8] sm:$0xff]  ;;  %v140_v3 = vld [vmem:[%s408_s15 + $0x10] sm:$0xff]  ;;  %vm147_vm1 = vcmask 130048   ;;  %s377_s16 = smov [#allocation2]   ;;  %vm170_vm2 = vcmask 122880  }
  0x16   : > { %v141_v4 = vld [vmem:[%s408_s15 + $0x18] sm:$0xff]  ;;  %v148_v5 = vsel %vm147_vm1, %v138_v1, 0.0  ;;  %v149_v6 = vsel %vm147_vm1, %v139_v2, 0.0  ;;  %v151_v7 = vsel %vm147_vm1, %v140_v3, 0.0  ;;  %v173_v8 = vmul.f32 %v138_v1, %v138_v1  ;;  %v142_v9 = vld [vmem:[%s408_s15 + $0x20] sm:$0xff]  ;;  %v143_v14 = vld [vmem:[%s408_s15 + $0x28] sm:$0xff] }
  0x17   : > { %v150_v10 = vadd.f32 %v149_v6, %v148_v5  ;;  %v174_v11 = vmul.f32 %v139_v2, %v139_v2  ;;  %v153_v12 = vsel %vm147_vm1, %v141_v4, 0.0  ;;  %v175_v13 = vmul.f32 %v140_v3, %v140_v3  ;;  %v144_v21 = vld [vmem:[%s408_s15 + $0x30] sm:$0xff]  ;;  %v145_v28 = vld [vmem:[%s408_s15 + $0x38] sm:$0xff]  ;;  %v146_v55 = vld [vmem:[#allocation2] sm:$0x1]  ;;  %s211_s17 = sshll.u32 %s377_s16, 4  ;;  %s212_s17 = int_to_ptr.vmem [resolvable:$true] %s211_s17 }
  0x18   : > { %v176_v16 = vmul.f32 %v141_v4, %v141_v4  ;;  %v155_v17 = vsel %vm147_vm1, %v142_v9, 0.0  ;;  %v177_v18 = vmul.f32 %v142_v9, %v142_v9  ;;  %v181_v19 = vsel %vm147_vm1, %v173_v8, 0.0  ;;  %p293_p5 = scmp.eq.s32.totalorder %s400_s10, 1  ;;  %v172_v60 = vld [vmem:[#allocation4] sm:$0x1]  ;;  %s378_s18 = smov [#allocation4]  }
  0x19   : > { %v152_v15 = vadd.f32 %v151_v7, %v150_v10  ;;  %v182_v20 = vsel %vm147_vm1, %v174_v11, 0.0  ;;  %v184_v24 = vsel %vm147_vm1, %v175_v13, 0.0  ;;  %v157_v25 = vsel %vm147_vm1, %v143_v14, 0.0  ;;  %s222_s19 = sshll.u32 %s378_s18, 4  ;;  %s308_s20 = scalar_lea.vmem %s212_s17, 16  ;;  %s223_s19 = int_to_ptr.vmem [resolvable:$true] %s222_s19 }
  0x1a   : > { %v183_v23 = vadd.f32 %v182_v20, %v181_v19  ;;  %v178_v26 = vmul.f32 %v143_v14, %v143_v14  ;;  %v186_v27 = vsel %vm147_vm1, %v176_v16, 0.0  ;;  %v159_v31 = vsel %vm147_vm1, %v144_v21, 0.0  ;;  %p309_p6 = scmp.ne.s32.totalorder %s212_s17, %s308_s20  ;;  %s314_s21 = scalar_lea.vmem %s212_s17, 32 }
  0x1b   : > { %v154_v22 = vadd.f32 %v153_v12, %v152_v15  ;;  %v179_v32 = vmul.f32 %v144_v21, %v144_v21  ;;  %v188_v33 = vsel %vm147_vm1, %v177_v18, 0.0  ;;  %v161_v36 = vsel %vm147_vm1, %v145_v28, 0.0  ;;  %p315_p9 = scmp.lt.s32.totalorder %s212_s17, %s212_s17  ;;  %p316_p10 = scmp.lt.s32.totalorder %s314_s21, %s308_s20 }
  0x1c   : > { %v185_v30 = vadd.f32 %v184_v24, %v183_v23  ;;  %v180_v37 = vmul.f32 %v145_v28, %v145_v28  ;;  %v190_v38 = vsel %vm147_vm1, %v178_v26, 0.0  ;;  %p310_p7 = pnand %p309_p6, %p293_p5 }
  0x1d   : > { %v156_v29 = vadd.f32 %v155_v17, %v154_v22  ;;  %v192_v41 = vsel %vm147_vm1, %v179_v32, 0.0  ;;  %p317_p11 = por %p316_p10, %p315_p9 }
  0x1e   : > { %v187_v35 = vadd.f32 %v186_v27, %v185_v30  ;;  %v194_v44 = vsel %vm147_vm1, %v180_v37, 0.0  ;;  %p311_p8 = pneg %p310_p7 }
  0x1f   : > { %v158_v34 = vadd.f32 %v157_v25, %v156_v29 }
  0x20   : > { %v189_v40 = vadd.f32 %v188_v33, %v187_v35  ;;  %p318_p12 = pnand %p317_p11, %p311_p8 }
  0x21   : > { %v160_v39 = vadd.f32 %v159_v31, %v158_v34 }
  0x22   : > { %v191_v43 = vadd.f32 %v190_v38, %v189_v40 }
  0x23   : > { %v162_v42 = vadd.f32 %v161_v36, %v160_v39 }
  0x24   : > { %v193_v46 = vadd.f32 %v192_v41, %v191_v43 }
  0x25   : > { %v163_v45 = vrot.slane %v162_v42, 4 }
  0x26   : > { %v195_v48 = vadd.f32 %v194_v44, %v193_v46 }
  0x27   : > { %v164_v47 = vadd.f32 %v163_v45, %v162_v42 }
  0x28   : > { %v196_v50 = vrot.slane %v195_v48, 4 }
  0x29   : > { %v165_v49 = vrot.slane %v164_v47, 2 }
  0x2a   : > { %v197_v52 = vadd.f32 %v196_v50, %v195_v48 }
  0x2b   : > { %v166_v51 = vadd.f32 %v165_v49, %v164_v47 }
  0x2c   : > { %v198_v54 = vrot.slane %v197_v52, 2 }
  0x2d   : > { %v167_v53 = vrot.slane %v166_v51, 1 }
  0x2e   : > { %v199_v57 = vadd.f32 %v198_v54, %v197_v52 }
  0x2f   : > { %v168_v56 = vadd.f32 %v167_v53, %v166_v51 }
  0x30   : > { %v200_v59 = vrot.slane %v199_v57, 1 }
  0x31   : > { %v169_v58 = vadd.f32 %v168_v56, %v146_v55 }
  0x32   : > { %v201_v61 = vadd.f32 %v200_v59, %v199_v57 }
  0x33   : > { %171 = vst.msk [vmem:[#allocation2] sm:$0x1] %vm170_vm2, %v169_v58 }
  0x34   : > { %321 = shalt.err (!%p318_p12)
}
  0x35   : > { %s322_s24 = scalar_lea.hbm %s486_s1, 16 }
  0x36   : > { %p323_p13 = scmp.ne.s32.totalorder %s486_s1, %s322_s24  ;;  %p328_p2 = scmp.lt.u32.totalorder %s322_s24, %s486_s1 }
  0x38   : > { %p324_p0 = pnand %p323_p13, %p293_p5 }
  0x3a   : > { %p325_p1 = pneg %p324_p0 }
  0x3c   : > { %p330_p3 = pnand %p328_p2, %p325_p1 }
  0x3e   : > { %333 = shalt.err (!%p330_p3)
}
  0x3f   : > { %286 = dma.vmem_to_hbm [thread:$0]  (%p293_p5), %s212_s17, 16, %s486_s1, [#allocation3]   ;;  %v202_v62 = vadd.f32 %v201_v61, %v172_v60 }
  0x40   : > { %s334_s3 = scalar_lea.vmem %s223_s19, 16  ;;  %s340_s4 = scalar_lea.vmem %s223_s19, 32 }
  0x41   : > { %203 = vst.msk [vmem:[#allocation4] sm:$0x1] %vm170_vm2, %v202_v62  ;;  %p335_p4 = scmp.ne.s32.totalorder %s223_s19, %s334_s3  ;;  %p341_p8 = scmp.lt.s32.totalorder %s223_s19, %s223_s19 }
  0x42   : > { %p342_p9 = scmp.lt.s32.totalorder %s340_s4, %s334_s3 }
  0x43   : > { %p336_p6 = pnand %p335_p4, %p293_p5 }
  0x44   : > { %p343_p10 = por %p342_p9, %p341_p8 }
  0x45   : > { %p337_p7 = pneg %p336_p6 }
  0x47   : > { %p344_p11 = pnand %p343_p10, %p337_p7 }
  0x49   : > { %347 = shalt.err (!%p344_p11)
}
  0x4a   : > { %s348_s7 = scalar_lea.hbm %s487_s2, 16 }
  0x4b   : > { %p349_p12 = scmp.ne.s32.totalorder %s487_s2, %s348_s7  ;;  %p354_p1 = scmp.lt.u32.totalorder %s348_s7, %s487_s2 }
  0x4d   : > { %p350_p13 = pnand %p349_p12, %p293_p5 }
  0x4f   : > { %p351_p0 = pneg %p350_p13 }
  0x51   : > { %p356_p2 = pnand %p354_p1, %p351_p0 }
  0x53   : > { %359 = shalt.err (!%p356_p2)
}
  0x54   : > { %288 = dma.vmem_to_hbm [thread:$0]  (%p293_p5), %s223_s19, 16, %s487_s2, [#allocation5]  }
  0x55   : > { %365 = dma.done.wait (%p293_p5), [#allocation3], 16  }
  0x56   : > { %367 = vsyncadd (%p293_p5), [#allocation3], 4294967280 }
  0x57   : > { %369 = dma.done.wait (%p293_p5), [#allocation5], 16  }
  0x58   : > { %371 = vsyncadd (%p293_p5), [#allocation5], 4294967280 }
  0x59 PF: > { %s15_s9 = sadd.s32 1, %s374_s9  }
  0x5a   : > { %p12_p3 = scmp.ge.s32.totalorder %s15_s9, 4  }
  0x5c   :  { %14 = sbr.rel (!%p12_p3) target bundleno = 2 (0x2), region = 63 }
  0x63   :  { %239 = vsyncpa [#allocation3], 1 }
  0x64   :  { %241 = vsyncpa [#allocation3 + $0x1], 1 }
  0x65   :  { %242 = vsyncpa [#allocation5], 1 }

</bundles_post_ra>
